<compile_context>
chip_gen: v6e
topology: v6e:2x2x1
jax: 0.10.0
libtpu: 0.0.40
codegen_flags: <defaults>
</compile_context>

<pallas_src>
import jax
import jax.numpy as jnp
from jax.experimental import pallas as pl
from jax.experimental.pallas import tpu as pltpu

LANE = 128


def _round_up(x, m):
    return ((x + m - 1) // m) * m


# ----------------------------------------------------------------------------
# Kernel 1: conv-as-matmul (bf16 operands, f32 MXU accumulation) fused with the
#           per-block partial channel statistics needed for BatchNorm.
#           Each grid step writes its own (8, Cp) stats slab (row 0 = sum,
#           row 1 = sum of squares); the tiny (grid_m, 8, Cp) array is reduced
#           in the wrapper, so the grid stays fully parallel (megacore-friendly).
# ----------------------------------------------------------------------------
def conv_stats_kernel(p_ref, w_ref, y_ref, stat_ref):
    y = jnp.dot(p_ref[...], w_ref[...], preferred_element_type=jnp.float32)
    y_ref[...] = y.astype(y_ref.dtype)                     # bf16 intermediate
    s = jnp.sum(y, axis=0, keepdims=True)                  # (1, Cp)
    sq = jnp.sum(y * y, axis=0, keepdims=True)             # (1, Cp)
    pad = jnp.zeros((stat_ref.shape[0] - 2, y.shape[1]), jnp.float32)
    stat_ref[...] = jnp.concatenate([s, sq, pad], axis=0)  # (8, Cp)


# ----------------------------------------------------------------------------
# Kernel 2: BatchNorm (pre-folded per-channel scale/shift) + ReLU, elementwise.
#           Math in f32 (VPU-friendly on v5e), lane-dense (tm, Cp) tiles.
# ----------------------------------------------------------------------------
def bn_relu_kernel(y_ref, scale_ref, shift_ref, o_ref):
    y = y_ref[...].astype(jnp.float32)
    o_ref[...] = jnp.maximum(y * scale_ref[...] + shift_ref[...], 0.0)


def conv2d_bn_forward(x_nchw, w, b, gamma, beta, *, stride=1, padding=1,
                      eps=1e-5, tm=512):
    """Forward of conv2d_bn: relu(batchnorm(conv2d(x))), training-mode BN stats.

    x_nchw: (N, Cin, H, W) float32   (PyTorch layout)
    w:      (Cout, Cin, KH, KW)      (PyTorch conv weight layout)
    b:      (Cout,)                  (unused in math: bias cancels under BN)
    gamma, beta: (Cout,)             (BatchNorm affine params)
    Returns (N, Cout, OH, OW) float32.
    """
    del b  # A per-channel bias before training-mode BN cancels exactly.
    N, Cin, H, W = x_nchw.shape
    Cout, _, KH, KW = w.shape
    OH = (H + 2 * padding - KH) // stride + 1
    OW = (W + 2 * padding - KW) // stride + 1

    K = KH * KW * Cin
    M = N * OH * OW
    Cp = _round_up(Cout, LANE)           # lane-dense output channels
    tm = min(tm, _round_up(M, 8))        # don't over-tile tiny problems
    tm = _round_up(tm, 8)
    grid_m = pl.cdiv(M, tm)
    M_pad = grid_m * tm                  # zero rows contribute 0 to stats

    # ---- glue: NCHW -> NHWC, pad, im2col (emitted directly in bf16) ----
    # TODO(synk): patches are still materialized in HBM (though in bf16);
    # fully fusing the KH*KW tap loop into kernel 1 would remove the remaining
    # read amplification.
    x = jnp.transpose(x_nchw, (0, 2, 3, 1))                       # (N, H, W, Cin)
    x_pad = jnp.pad(x, ((0, 0), (padding, padding), (padding, padding), (0, 0)))
    cols = []
    for kh in range(KH):
        for kw in range(KW):
            cols.append(x_pad[:, kh:kh + OH * stride:stride,
                              kw:kw + OW * stride:stride, :])     # (N, OH, OW, Cin)
    patches = jnp.concatenate(cols, axis=-1).reshape(M, K).astype(jnp.bfloat16)
    if M_pad != M:
        patches = jnp.pad(patches, ((0, M_pad - M), (0, 0)))

    # weight: (Cout, Cin, KH, KW) -> (K, Cout) matching (kh, kw, cin) order,
    # zero-padded to (K, Cp) and cast to bf16.
    w_mat = jnp.transpose(w, (2, 3, 1, 0)).reshape(K, Cout)
    w_mat = jnp.pad(w_mat, ((0, 0), (0, Cp - Cout))).astype(jnp.bfloat16)

    cparams = pltpu.CompilerParams(
        dimension_semantics=("parallel",),
        vmem_limit_bytes=48 * 1024 * 1024)

    # ---- Pallas call 1: conv matmul + per-block partial batch stats ----
    # TODO(synk): add an inner K grid axis with an f32 VMEM accumulator once
    # Cin*KH*KW grows beyond what a resident (K, Cp) weight block allows.
    y, stats = pl.pallas_call(
        conv_stats_kernel,
        out_shape=(
            jax.ShapeDtypeStruct((M_pad, Cp), jnp.bfloat16),
            jax.ShapeDtypeStruct((grid_m * 8, Cp), jnp.float32),
        ),
        grid_spec=pltpu.PrefetchScalarGridSpec(
            num_scalar_prefetch=0,
            grid=(grid_m,),
            in_specs=[
                pl.BlockSpec((tm, K), lambda i: (i, 0)),
                pl.BlockSpec((K, Cp), lambda i: (0, 0)),
            ],
            out_specs=[
                pl.BlockSpec((tm, Cp), lambda i: (i, 0)),
                pl.BlockSpec((8, Cp), lambda i: (i, 0)),
            ],
        ),
        compiler_params=cparams,
    )(patches, w_mat)

    # ---- glue: reduce the tiny partial stats, fold into scale/shift ----
    st = stats.reshape(grid_m, 8, Cp)
    ch_sum = jnp.sum(st[:, 0, :], axis=0)
    ch_ssq = jnp.sum(st[:, 1, :], axis=0)
    mean = ch_sum / M                                   # padded rows are zero
    var = jnp.maximum(ch_ssq / M - mean * mean, 0.0)    # guard cancellation
    gamma_p = jnp.pad(gamma.astype(jnp.float32), (0, Cp - Cout))
    beta_p = jnp.pad(beta.astype(jnp.float32), (0, Cp - Cout))
    scale = (gamma_p / jnp.sqrt(var + eps)).reshape(1, Cp)
    shift = (beta_p - mean * (gamma_p / jnp.sqrt(var + eps))).reshape(1, Cp)
    # TODO(synk): running_mean/running_var buffer updates of nn.BatchNorm2d are
    # training-state side effects and are not reproduced here.

    # ---- Pallas call 2: BN affine + ReLU (lane-dense tiles) ----
    out = pl.pallas_call(
        bn_relu_kernel,
        out_shape=jax.ShapeDtypeStruct((M_pad, Cp), jnp.float32),
        grid_spec=pltpu.PrefetchScalarGridSpec(
            num_scalar_prefetch=0,
            grid=(grid_m,),
            in_specs=[
                pl.BlockSpec((tm, Cp), lambda i: (i, 0)),
                pl.BlockSpec((1, Cp), lambda i: (0, 0)),
                pl.BlockSpec((1, Cp), lambda i: (0, 0)),
            ],
            out_specs=pl.BlockSpec((tm, Cp), lambda i: (i, 0)),
        ),
        compiler_params=cparams,
    )(y, scale, shift)

    # ---- glue: strip padding, back to NCHW ----
    out = out[:M, :Cout].reshape(N, OH, OW, Cout)
    return jnp.transpose(out, (0, 3, 1, 2))


def _reference_forward(x_nchw, w, b, gamma, beta, *, stride=1, padding=1, eps=1e-5):
    """Pure-JAX f32 reference (conv+bias + training-mode BN + ReLU)."""
    y = jax.lax.conv_general_dilated(
        x_nchw, w, window_strides=(stride, stride),
        padding=[(padding, padding), (padding, padding)],
        dimension_numbers=("NCHW", "OIHW", "NCHW"))
    y = y + b.reshape(1, -1, 1, 1)
    mean = jnp.mean(y, axis=(0, 2, 3), keepdims=True)
    var = jnp.mean((y - mean) ** 2, axis=(0, 2, 3), keepdims=True)
    yhat = (y - mean) / jnp.sqrt(var + eps)
    yhat = yhat * gamma.reshape(1, -1, 1, 1) + beta.reshape(1, -1, 1, 1)
    return jnp.maximum(yhat, 0.0)


if __name__ == "__main__":
    # Small shapes consistent with conv2d_bn(in_channels=4, out_channels=8).
    N, Cin, H, W = 2, 4, 16, 16
    Cout, KH, KW = 8, 3, 3

    key = jax.random.PRNGKey(0)
    kx, kw_, kb, kg, kbt = jax.random.split(key, 5)
    x = jax.random.normal(kx, (N, Cin, H, W), dtype=jnp.float32)
    w = jax.random.normal(kw_, (Cout, Cin, KH, KW), dtype=jnp.float32) * 0.1
    b = jax.random.normal(kb, (Cout,), dtype=jnp.float32) * 0.1
    gamma = jnp.ones((Cout,), jnp.float32) + 0.1 * jax.random.normal(kg, (Cout,))
    beta = 0.1 * jax.random.normal(kbt, (Cout,), dtype=jnp.float32)

    # tm=256 on the tiny demo so the multi-block partial-stats path is
    # exercised (grid_m=2); production default is tm=512.
    out = conv2d_bn_forward(x, w, b, gamma, beta, tm=256)
    out = jax.block_until_ready(out)

    ref = _reference_forward(x, w, b, gamma, beta)
    assert out.shape == (N, Cout, H, W), out.shape
    max_err = float(jnp.max(jnp.abs(out - ref)))
    # bf16 matmul operands + bf16 intermediate y -> bf16-level tolerance.
    assert jnp.allclose(out, ref, atol=3e-2, rtol=3e-2), max_err
    print("KERNEL_OK")
</pallas_src>

<mosaic_0001>
module attributes {stable_mosaic.version = 11 : i64} {
  func.func @conv_stats_kernel(%arg0: i32, %arg1: memref<256x36xbf16, #tpu.memory_space<vmem>>, %arg2: memref<36x128xbf16, #tpu.memory_space<vmem>>, %arg3: memref<256x128xbf16, #tpu.memory_space<vmem>>, %arg4: memref<8x128xf32, #tpu.memory_space<vmem>>) attributes {dimension_semantics = [#tpu.dimension_semantics<parallel>], iteration_bounds = array<i64: 2>, scalar_prefetch = 0 : i64, scratch_operands = 0 : i64, tpu.core_type = #tpu.core_type<tc>, window_params = [{transform_indices = @transform_0, window_bounds = array<i64: 256, 36>}, {pipeline_mode = #tpu.pipeline_mode<synchronous>, transform_indices = @transform_1, window_bounds = array<i64: 36, 128>}, {transform_indices = @transform_2, window_bounds = array<i64: 256, 128>}, {transform_indices = @transform_3, window_bounds = array<i64: 8, 128>}]} {
    %c0 = arith.constant 0 : index
    %c0_0 = arith.constant 0 : index
    %0 = vector.load %arg1[%c0, %c0_0] : memref<256x36xbf16, #tpu.memory_space<vmem>>, vector<256x36xbf16>
    %c0_1 = arith.constant 0 : index
    %c0_2 = arith.constant 0 : index
    %1 = vector.load %arg2[%c0_1, %c0_2] : memref<36x128xbf16, #tpu.memory_space<vmem>>, vector<36x128xbf16>
    %cst = arith.constant dense<0.000000e+00> : vector<256x128xf32>
    %2 = tpu.matmul %0, %1, %cst {dimension_numbers = #tpu.dot_dimension_numbers<[1], [0], [0], [1], [0, 0, 1, 1], [], []>} : vector<256x36xbf16>, vector<36x128xbf16>, vector<256x128xf32> -> vector<256x128xf32>
    %3 = arith.truncf %2 : vector<256x128xf32> to vector<256x128xbf16>
    %c0_3 = arith.constant 0 : index
    %c0_4 = arith.constant 0 : index
    %4 = vector.load %arg3[%c0_3, %c0_4] : memref<256x128xbf16, #tpu.memory_space<vmem>>, vector<256x128xbf16>
    tpu.vector_store %arg3[%c0_3, %c0_4], %3 {strides = array<i32>} : memref<256x128xbf16, #tpu.memory_space<vmem>>, vector<256x128xbf16>,
    %cst_5 = arith.constant dense<0.000000e+00> : vector<128xf32>
    %5 = vector.multi_reduction <add>, %2, %cst_5 [0] : vector<256x128xf32> to vector<128xf32>
    %6 = vector.shape_cast %5 : vector<128xf32> to vector<1x128xf32>
    %7 = arith.mulf %2, %2 : vector<256x128xf32>
    %cst_6 = arith.constant dense<0.000000e+00> : vector<128xf32>
    %8 = vector.multi_reduction <add>, %7, %cst_6 [0] : vector<256x128xf32> to vector<128xf32>
    %9 = vector.shape_cast %8 : vector<128xf32> to vector<1x128xf32>
    %cst_7 = arith.constant 0.000000e+00 : f32
    %10 = vector.broadcast %cst_7 : f32 to vector<6x128xf32>
    %11 = tpu.concatenate %6, %9, %10 in 0 : vector<1x128xf32>, vector<1x128xf32>, vector<6x128xf32> -> vector<8x128xf32>
    %c0_8 = arith.constant 0 : index
    %c0_9 = arith.constant 0 : index
    %12 = vector.load %arg4[%c0_8, %c0_9] : memref<8x128xf32, #tpu.memory_space<vmem>>, vector<8x128xf32>
    tpu.vector_store %arg4[%c0_8, %c0_9], %11 {strides = array<i32>} : memref<8x128xf32, #tpu.memory_space<vmem>>, vector<8x128xf32>,
    return
  }
  func.func @transform_0(%arg0: i32) -> (i32, i32) {
    %c0_i32 = arith.constant 0 : i32
    %c0_i32_0 = arith.constant 0 : i32
    return %arg0, %c0_i32 : i32, i32
  }
  func.func @transform_1(%arg0: i32) -> (i32, i32) {
    %c0_i32 = arith.constant 0 : i32
    %c0_i32_0 = arith.constant 0 : i32
    %c0_i32_1 = arith.constant 0 : i32
    return %c0_i32, %c0_i32_0 : i32, i32
  }
  func.func @transform_2(%arg0: i32) -> (i32, i32) {
    %c0_i32 = arith.constant 0 : i32
    %c0_i32_0 = arith.constant 0 : i32
    return %arg0, %c0_i32 : i32, i32
  }
  func.func @transform_3(%arg0: i32) -> (i32, i32) {
    %c0_i32 = arith.constant 0 : i32
    %c0_i32_0 = arith.constant 0 : i32
    return %arg0, %c0_i32 : i32, i32
  }
}

</mosaic_0001>

<bundles_post_ra>
// kernel: tpu_custom_call.1
= control target key start
LH: loop header
LB: loop body
LE: loop exit
PB: predicated region body
PF: predicated region fallthrough
CT: control target
= control target key end

     0   :  { %9 = vsyncpa [#allocation3], 0  ;;  %s1672_s0 = inlined_call_operand.vmem [shape: bf16[512,36], index: 0, kind: input, shape index: {}]   ;;  %s1673_s1 = inlined_call_operand.vmem [shape: bf16[36,128], index: 1, kind: input, shape index: {}]   ;;  %s1674_s2 = inlined_call_operand.hbm [shape: bf16[512,128], index: 2, kind: output, shape index: {0}]   ;;  %s1675_s3 = inlined_call_operand.hbm [shape: f32[16,128], index: 3, kind: output, shape index: {1}]  }
   0x1   :  { %11 = vsyncpa [#allocation3 + $0x1], 0 }
   0x2   :  { %12 = vsyncpa [#allocation5], 0 }
   0x3   :  { %14 = vsyncpa [#allocation5 + $0x1], 0  ;;  %s1382_s12 = smov 0   ;;  %s1384_s13 = smov 0  }
   0x4   :  { %s1386_s14 = smov 0   ;;  %s1388_s15 = smov 0  }
   0x5 LB: > { %s1403_s16 = sadd.s32 4294967295, %s1356_s15   ;;  %s926_s17 = sadd.s32 4294967294, %s1356_s15   ;;  %s1356_s15 = sphi %s1388_s15, %s1681_s15   ;;  %s1352_s14 = sphi %s1386_s14, %s1680_s14   ;;  %s1348_s13 = sphi %s1384_s13, %s1679_s13   ;;  %s1344_s12 = sphi %s1382_s12, %s1678_s12  }
   0x6   : > { %s1407_s18 = sadd.s32 1, %s1356_s15   ;;  %s74_s19 = sadd.s32 1, %s1352_s14 }
   0x7   : > { %s71_s20 = ssub.s32 %s1356_s15, %s1407_s18  ;;  %p84_p0 = scmp.ne.s32.totalorder %s1352_s14, %s1348_s13 }
   0x8   : > { %p72_p1 = scmp.eq.s32.totalorder %s71_s20, 0  ;;  %p85_p2 = scmp.eq.s32.totalorder %s1403_s16, 1 }
   0x9   : > { %p90_p3 = scmp.ne.s32.totalorder %s1348_s13, %s1344_s12  ;;  %p91_p4 = scmp.eq.s32.totalorder %s926_s17, 1 }
   0xa   : > { %s1418_s21 = scalar_select %p72_p1, %s1352_s14, %s74_s19  }
   0xb   : > { %p1420_p5 = por %p85_p2, %p84_p0  ;;  %p1424_p6 = por %p91_p4, %p90_p3 }
   0xc   : > { %p929_p7 = scmp.ge.s32.totalorder %s1356_s15, 1  ;;  %p147_p8 = scmp.lt.s32.totalorder %s1356_s15, 3 }
   0xe   : > { %p148_p9 = pnand %p929_p7, %p147_p8 }
   0xf   : > { %s932_s28 = sshll.u32 (!%p148_p9), %s1403_s16, 5  ;;  %s1481_s8 = sand.u32 (!%p148_p9), 1, %s1348_s13  }
  0x10   : > { %151 = sbr.rel (%p148_p9) target bundleno = 334 (0x14e), region = 28  ;;  %p177_p10 = scmp.lt.s32.totalorder (!%p148_p9), %s932_s28, 63 }
  0x11   : > { %s930_s9 = sshll.u32 (!%p148_p9), %s1481_s8, 7  ;;  %s1040_s11 = sshll.u32 (!%p148_p9), %s1403_s16, 11 }
  0x12   : > { %s1486_s10 = scalar_lea.vmem (!%p148_p9), [#allocation2], %s930_s9  ;;  %s1551_s24 = scalar_lea.hbm (!%p148_p9), %s1674_s2, %s1040_s11 }
  0x13   : > { %s819_s17 = sshll.u32 (!%p148_p9), %s1486_s10, 4  ;;  %s801_s25 = scalar_lea.sflag (!%p148_p9), [#allocation3], %s1481_s8  ;;  %s1553_s17 = int_to_ptr.vmem [resolvable:$true] %s819_s17 }
  0x14   : > { %s1266_s26 = scalar_lea.vmem (!%p148_p9), %s1553_s17, 2048  ;;  %s1358_s27 = smov (!%p148_p9), [#allocation2]  }
  0x15   : > { %v1247_v0 = vld [vmem:[%s1673_s1 + $0x10] ss:$0 sps:$4 sm:$0x33]   ;;  %vm365_vm0 = vcmask 1041408   ;;  %v1248_v1 = vld [vmem:[%s1673_s1 + $0x8] sm:$0xff]   ;;  %v1249_v3 = vld [vmem:[%s1673_s1] sm:$0xff]   ;;  %p1267_p11 = scmp.ne.s32.totalorder %s1553_s17, %s1266_s26 }
  0x16   : > { %1199 = vmatprep.subr.msk.bf16.mxu0 %vm365_vm0, %v1247_v0  ;;  %v367_v2 = vsel %vm365_vm0, %v1247_v0, 0  ;;  %1200 = vmatprep.subr.msk.bf16.mxu1 %vm365_vm0, %v1247_v0  ;;  %s1683_s28 = smov (!%p177_p10, %s932_s28), 63  ;;  %vm316_vm1 = vcmask 293888  }
  0x17   : > { %1156 = vmatpush3.bf16.msra.mxu0 %v367_v2  ;;  %1196 = vmatpush3.bf16.msra.mxu1 %v367_v2  ;;  %s933_s4 = sshll.u32 %s1683_s28, 2  ;;  %p1268_p12 = pnand %p1267_p11, %p1420_p5 }
  0x18   : > { %1157 = vmatprep.subr.bf16.mxu0 %v1248_v1  ;;  %1194 = vmatprep.subr.bf16.mxu1 %v1248_v1  ;;  %s1446_s7 = scalar_lea.vmem %s1672_s0, %s933_s4  ;;  %s1270_s28 = sshll.u32 %s1358_s27, 4  ;;  %s1271_s28 = int_to_ptr.vmem [resolvable:$false] %s1270_s28 }
  0x19   : > { %v1250_v4 = vld [vmem:[%s1446_s7] sm:$0xff]   ;;  %v1251_v5 = vld [vmem:[%s1446_s7 + $0x8] sm:$0xff]   ;;  %v1252_v6 = vld [vmem:[%s1446_s7 + $0x10] sm:$0xff]   ;;  %p1269_p13 = pneg %p1268_p12  ;;  %s1272_s29 = scalar_lea.vmem %s1271_s28, 4096 }
  0x1a   : > { %1161 = vmatprep.mubr.msk.bf16.mxu0 %vm316_vm1, %v1250_v4  ;;  %v1253_v7 = vld [vmem:[%s1446_s7 + $0x18] sm:$0xff]   ;;  %v1254_v8 = vld [vmem:[%s1446_s7 + $0x20] sm:$0xff]   ;;  %v1259_v10 = vld [vmem:[%s1446_s7 + $0x48] sm:$0xff]   ;;  %p1273_p0 = scmp.lt.s32.totalorder %s1553_s17, %s1271_s28  ;;  %p1274_p1 = scmp.lt.s32.totalorder %s1272_s29, %s1266_s26 }
  0x1b   : > { %1158 = vmatpush3.bf16.msra.mxu0 %v1248_v1  ;;  %1197 = vmatpush3.bf16.msra.mxu1 %v1248_v1  ;;  %v1258_v9 = vld [vmem:[%s1446_s7 + $0x40] sm:$0xff]   ;;  %v1260_v11 = vld [vmem:[%s1446_s7 + $0x50] sm:$0xff]   ;;  %v1261_v12 = vld [vmem:[%s1446_s7 + $0x58] sm:$0xff]  }
  0x1c   : > { %1159 = vmatprep.subr.bf16.mxu0 %v1249_v3  ;;  %1195 = vmatprep.subr.bf16.mxu1 %v1249_v3  ;;  %v1262_v13 = vld [vmem:[%s1446_s7 + $0x60] sm:$0xff]   ;;  %v1255_v14 = vld [vmem:[%s1446_s7 + $0x28] sm:$0xff]   ;;  %v1256_v15 = vld [vmem:[%s1446_s7 + $0x30] sm:$0xff]   ;;  %p1275_p2 = por %p1274_p1, %p1273_p0 }
  0x1d   : > { %1177 = vmatprep.mubr.msk.bf16.mxu1 %vm316_vm1, %v1258_v9  ;;  %v1263_v16 = vld [vmem:[%s1446_s7 + $0x68] sm:$0xff]   ;;  %v1264_v17 = vld [vmem:[%s1446_s7 + $0x70] sm:$0xff]   ;;  %v1257_v18 = vld [vmem:[%s1446_s7 + $0x38] sm:$0xff]  }
  0x1e   : > { %v1265_v19 = vld [vmem:[%s1446_s7 + $0x78] sm:$0xff]   ;;  %p1276_p3 = pnand %p1275_p2, %p1269_p13 }
  0x1f   : > { %1160 = vmatpush3.bf16.msra.mxu0 %v1249_v3  ;;  %1198 = vmatpush3.bf16.msra.mxu1 %v1249_v3 }
  0x22   : > { %1162 = vmatmul.mubr.msk.bf16.vlgmr.msra.gmra.mxu0 %vm316_vm1, %v1251_v5  ;;  %1178 = vmatmul.mubr.msk.bf16.vlgmr.msra.gmra.mxu1 %vm316_vm1, %v1259_v10 }
  0x23   : > { %1165 = vmatprep.mubr.msk.bf16.mxu0 %vm316_vm1, %v1252_v6  ;;  %1181 = vmatprep.mubr.msk.bf16.mxu1 %vm316_vm1, %v1260_v11 }
  0x2a   : > { %1166 = vmatmul.mubr.msk.bf16.gmra.mxu0 %vm316_vm1, %v1253_v7  ;;  %1182 = vmatmul.mubr.msk.bf16.gmra.mxu1 %vm316_vm1, %v1261_v12 }
  0x2b   : > { %1169 = vmatprep.mubr.msk.bf16.mxu0 %vm316_vm1, %v1254_v8  ;;  %1185 = vmatprep.mubr.msk.bf16.mxu1 %vm316_vm1, %v1262_v13 }
  0x32   : > { %1170 = vmatmul.mubr.msk.bf16.gmra.mxu0 %vm316_vm1, %v1255_v14  ;;  %1186 = vmatmul.mubr.msk.bf16.gmra.mxu1 %vm316_vm1, %v1263_v16 }
  0x33   : > { %1173 = vmatprep.mubr.msk.bf16.mxu0 %vm316_vm1, %v1256_v15  ;;  %1189 = vmatprep.mubr.msk.bf16.mxu1 %vm316_vm1, %v1264_v17 }
  0x3a   : > { %1174 = vmatmul.mubr.msk.bf16.gmra.mxu0 %vm316_vm1, %v1257_v18  ;;  %1190 = vmatmul.mubr.msk.bf16.gmra.mxu1 %vm316_vm1, %v1265_v19 }
  0xe2   : > { %v1163_v20 = vpop.f32.mrf.mxu0  ;;  %v1484_v25 = vpop.f32.mrf.mxu1 }
  0xe3   : > { %v729_v32 = vmul.f32 %v1163_v20, %v1163_v20 }
  0xe4   : > { %v403_v21 = vpop.f32.mrf.mxu0  ;;  %v1489_v31 = vpop.f32.mrf.mxu1 }
  0xe5   : > { %v727_v26 = vmul.f32 %v403_v21, %v403_v21 }
  0xe6   : > { %v1164_v22 = vpop.f32.mrf.mxu0  ;;  %v1492_v36 = vpop.f32.mrf.mxu1 }
  0xe7   : > { %v1049_v23 = vpack.c.bf16 %v1164_v22, %v1163_v20  ;;  %v730_v37 = vmul.f32 %v1164_v22, %v1164_v22  ;;  %v1089_v40 = vpack.c.bf16 %v1492_v36, %v1484_v25 }
  0xe8   : > { %v406_v24 = vpop.f32.mrf.mxu0  ;;  %v1496_v42 = vpop.f32.mrf.mxu1 }
  0xe9   : > { %1121 = vst [vmem:[%s1486_s10 + $0x8] sm:$0xff] %v1049_v23   ;;  %v1044_v27 = vpack.c.bf16 %v406_v24, %v403_v21  ;;  %v690_v28 = vadd.f32 %v406_v24, %v403_v21  ;;  %v728_v29 = vmul.f32 %v406_v24, %v406_v24  ;;  %1129 = vst [vmem:[%s1486_s10 + $0x48] sm:$0xff] %v1089_v40  }
  0xea   : > { %v1167_v30 = vpop.f32.mrf.mxu0  ;;  %v1084_v48 = vpack.c.bf16 %v1496_v42, %v1489_v31  ;;  %v1501_v49 = vpop.f32.mrf.mxu1 }
  0xeb   : > { %1045 = vst [vmem:[%s1486_s10] sm:$0xff] %v1044_v27   ;;  %v691_v33 = vadd.f32 %v1163_v20, %v690_v28  ;;  %v759_v34 = vadd.f32 %v728_v29, %v727_v26  ;;  %v733_v56 = vmul.f32 %v1167_v30, %v1167_v30 }
  0xec   : > { %v419_v35 = vpop.f32.mrf.mxu0  ;;  %1128 = vst [vmem:[%s1486_s10 + $0x40] sm:$0xff] %v1084_v48   ;;  %v1505_v55 = vpop.f32.mrf.mxu1 }
  0xed   : > { %v760_v38 = vadd.f32 %v759_v34, %v729_v32  ;;  %v692_v39 = vadd.f32 %v1164_v22, %v691_v33  ;;  %v731_v44 = vmul.f32 %v419_v35, %v419_v35 }
  0xee   : > { %v1168_v41 = vpop.f32.mrf.mxu0  ;;  %v1508_v60 = vpop.f32.mrf.mxu1 }
  0xef   : > { %v693_v43 = vadd.f32 %v692_v39, %v419_v35  ;;  %v761_v45 = vadd.f32 %v760_v38, %v730_v37  ;;  %v1059_v46 = vpack.c.bf16 %v1168_v41, %v1167_v30  ;;  %v734_v61 = vmul.f32 %v1168_v41, %v1168_v41 }
  0xf0   : > { %v422_v47 = vpop.f32.mrf.mxu0  ;;  %v1099_v0 = vpack.c.bf16 %v1508_v60, %v1501_v49  ;;  %v1512_v2 = vpop.f32.mrf.mxu1 }
  0xf1   : > { %v762_v50 = vadd.f32 %v761_v45, %v731_v44  ;;  %1123 = vst [vmem:[%s1486_s10 + $0x18] sm:$0xff] %v1059_v46   ;;  %v1054_v51 = vpack.c.bf16 %v422_v47, %v419_v35  ;;  %v694_v52 = vadd.f32 %v693_v43, %v422_v47  ;;  %v732_v53 = vmul.f32 %v422_v47, %v422_v47 }
  0xf2   : > { %v1171_v54 = vpop.f32.mrf.mxu0  ;;  %1131 = vst [vmem:[%s1486_s10 + $0x58] sm:$0xff] %v1099_v0   ;;  %v1094_v8 = vpack.c.bf16 %v1512_v2, %v1505_v55  ;;  %v1517_v9 = vpop.f32.mrf.mxu1 }
  0xf3   : > { %1122 = vst [vmem:[%s1486_s10 + $0x10] sm:$0xff] %v1054_v51   ;;  %v695_v57 = vadd.f32 %v1167_v30, %v694_v52  ;;  %v763_v58 = vadd.f32 %v762_v50, %v732_v53  ;;  %v737_v16 = vmul.f32 %v1171_v54, %v1171_v54  ;;  %v743_v53 = vmul.f32 %v1489_v31, %v1489_v31 }
  0xf4   : > { %v435_v59 = vpop.f32.mrf.mxu0  ;;  %1130 = vst [vmem:[%s1486_s10 + $0x50] sm:$0xff] %v1094_v8   ;;  %v1521_v15 = vpop.f32.mrf.mxu1 }
  0xf5   : > { %v764_v62 = vadd.f32 %v763_v58, %v733_v56  ;;  %v696_v63 = vadd.f32 %v1168_v41, %v695_v57  ;;  %v735_v4 = vmul.f32 %v435_v59, %v435_v59 }
  0xf6   : > { %v1172_v1 = vpop.f32.mrf.mxu0  ;;  %v1524_v20 = vpop.f32.mrf.mxu1 }
  0xf7   : > { %v697_v3 = vadd.f32 %v696_v63, %v435_v59  ;;  %v765_v5 = vadd.f32 %v764_v62, %v734_v61  ;;  %v1069_v6 = vpack.c.bf16 %v1172_v1, %v1171_v54  ;;  %v738_v21 = vmul.f32 %v1172_v1, %v1172_v1 }
  0xf8   : > { %v438_v7 = vpop.f32.mrf.mxu0  ;;  %v1109_v24 = vpack.c.bf16 %v1524_v20, %v1517_v9  ;;  %v1528_v27 = vpop.f32.mrf.mxu1 }
  0xf9   : > { %v766_v10 = vadd.f32 %v765_v5, %v735_v4  ;;  %1125 = vst [vmem:[%s1486_s10 + $0x28] sm:$0xff] %v1069_v6   ;;  %v1064_v11 = vpack.c.bf16 %v438_v7, %v435_v59  ;;  %v698_v12 = vadd.f32 %v697_v3, %v438_v7  ;;  %v736_v13 = vmul.f32 %v438_v7, %v438_v7 }
  0xfa   : > { %v1175_v14 = vpop.f32.mrf.mxu0  ;;  %1133 = vst [vmem:[%s1486_s10 + $0x68] sm:$0xff] %v1109_v24   ;;  %v1104_v34 = vpack.c.bf16 %v1528_v27, %v1521_v15  ;;  %v1533_v35 = vpop.f32.mrf.mxu1  ;;  %v744_v59 = vmul.f32 %v1496_v42, %v1496_v42 }
  0xfb   : > { %1124 = vst [vmem:[%s1486_s10 + $0x20] sm:$0xff] %v1064_v11   ;;  %v699_v17 = vadd.f32 %v1171_v54, %v698_v12  ;;  %v767_v18 = vadd.f32 %v766_v10, %v736_v13  ;;  %v741_v43 = vmul.f32 %v1175_v14, %v1175_v14 }
  0xfc   : > { %v451_v19 = vpop.f32.mrf.mxu0  ;;  %1132 = vst [vmem:[%s1486_s10 + $0x60] sm:$0xff] %v1104_v34   ;;  %v1537_v41 = vpop.f32.mrf.mxu1 }
  0xfd   : > { %v768_v22 = vadd.f32 %v767_v18, %v737_v16  ;;  %v700_v23 = vadd.f32 %v1172_v1, %v699_v17  ;;  %v739_v29 = vmul.f32 %v451_v19, %v451_v19 }
  0xfe   : > { %v1176_v26 = vpop.f32.mrf.mxu0  ;;  %v1542_v46 = vpop.f32.mrf.mxu1 }
  0xff   : > { %v701_v28 = vadd.f32 %v700_v23, %v451_v19  ;;  %v769_v30 = vadd.f32 %v768_v22, %v738_v21  ;;  %v1079_v32 = vpack.c.bf16 %v1176_v26, %v1175_v14  ;;  %v742_v47 = vmul.f32 %v1176_v26, %v1176_v26 }
 0x100   : > { %v454_v33 = vpop.f32.mrf.mxu0  ;;  %v1119_v51 = vpack.c.bf16 %v1542_v46, %v1533_v35  ;;  %v1546_v52 = vpop.f32.mrf.mxu1 }
 0x101   : > { %v770_v37 = vadd.f32 %v769_v30, %v739_v29  ;;  %1127 = vst [vmem:[%s1486_s10 + $0x38] sm:$0xff] %v1079_v32   ;;  %v1074_v38 = vpack.c.bf16 %v454_v33, %v451_v19  ;;  %v702_v39 = vadd.f32 %v701_v28, %v454_v33  ;;  %v740_v40 = vmul.f32 %v454_v33, %v454_v33 }
 0x102   : > { %1135 = vst [vmem:[%s1486_s10 + $0x78] sm:$0xff] %v1119_v51   ;;  %v1114_v57 = vpack.c.bf16 %v1546_v52, %v1537_v41 }
 0x103   : > { %1126 = vst [vmem:[%s1486_s10 + $0x30] sm:$0xff] %v1074_v38   ;;  %v703_v44 = vadd.f32 %v1175_v14, %v702_v39  ;;  %v771_v45 = vadd.f32 %v770_v37, %v740_v40 }
 0x104   : > { %1134 = vst [vmem:[%s1486_s10 + $0x70] sm:$0xff] %v1114_v57  }
 0x105   : > { %v704_v48 = vadd.f32 %v1176_v26, %v703_v44  ;;  %v772_v50 = vadd.f32 %v771_v45, %v741_v43 }
 0x107   : > { %v773_v54 = vadd.f32 %v772_v50, %v742_v47  ;;  %v705_v56 = vadd.f32 %v704_v48, %v1489_v31 }
 0x109   : > { %v706_v58 = vadd.f32 %v705_v56, %v1496_v42  ;;  %v774_v61 = vadd.f32 %v773_v54, %v743_v53 }
 0x10a   : > { %1279 = shalt.err (!%p1276_p3)
}
 0x10b   : > { %s1280_s30 = scalar_lea.hbm %s1551_s24, 2048  ;;  %s1284_s6 = scalar_lea.hbm %s1674_s2, 4096 }
 0x10c   : > { %p1281_p4 = scmp.ne.s32.totalorder %s1551_s24, %s1280_s30  ;;  %p1285_p9 = scmp.lt.s32.totalorder %s1551_s24, %s1674_s2 }
 0x10d   : > { %p1286_p10 = scmp.lt.s32.totalorder %s1284_s6, %s1280_s30 }
 0x10e   : > { %p1282_p7 = pnand %p1281_p4, %p1420_p5 }
 0x10f   : > { %p1287_p11 = por %p1286_p10, %p1285_p9 }
 0x110   : > { %p1283_p8 = pneg %p1282_p7 }
 0x112   : > { %p1288_p12 = pnand %p1287_p11, %p1283_p8 }
 0x114   : > { %1291 = shalt.err (!%p1288_p12)
}
 0x115   : > { %s1359_s10 = smov 64   ;;  %s1360_s11 = smov 4   ;;  %v745_v31 = vmul.f32 %v1484_v25, %v1484_v25  ;;  %v707_v42 = vadd.f32 %v1484_v25, %v706_v58  ;;  %v775_v62 = vadd.f32 %v774_v61, %v744_v59  ;;  %v746_v63 = vmul.f32 %v1492_v36, %v1492_v36 }
 0x116   : > { %1201 = dma.vmem_to_hbm [thread:$0]  (%p1420_p5), %s1553_s17, 2048, %s1551_s24, %s801_s25, %s1359_s10, %s1359_s10, %s1360_s11   ;;  %v747_v4 = vmul.f32 %v1505_v55, %v1505_v55  ;;  %v748_v8 = vmul.f32 %v1512_v2, %v1512_v2  ;;  %v749_v25 = vmul.f32 %v1501_v49, %v1501_v49  ;;  %v751_v14 = vmul.f32 %v1521_v15, %v1521_v15 }
 0x117   : > { %v776_v0 = vadd.f32 %v775_v62, %v745_v31  ;;  %v708_v1 = vadd.f32 %v1492_v36, %v707_v42  ;;  %v750_v36 = vmul.f32 %v1508_v60, %v1508_v60  ;;  %v752_v18 = vmul.f32 %v1528_v27, %v1528_v27  ;;  %s931_s17 = sshll.u32 %s1481_s8, 3  ;;  %s1005_s19 = sshll.u32 %s1403_s16, 7 }
 0x118   : > { %v755_v24 = vmul.f32 %v1537_v41, %v1537_v41  ;;  %v757_v29 = vmul.f32 %v1533_v35, %v1533_v35  ;;  %vm796_vm2 = vcmask 1040384   ;;  %s175_s20 = scalar_lea.vmem [#allocation4], %s931_s17  ;;  %s1635_s27 = scalar_lea.hbm %s1675_s3, %s1005_s19 }
 0x119   : > { %v709_v3 = vadd.f32 %v708_v1, %v1505_v55  ;;  %v777_v5 = vadd.f32 %v776_v0, %v746_v63  ;;  %s835_s24 = sshll.u32 %s175_s20, 4  ;;  %s806_s28 = scalar_lea.sflag [#allocation5], %s1481_s8  ;;  %s836_s24 = int_to_ptr.vmem [resolvable:$true] %s835_s24 }
 0x11a   : > { %s1292_s29 = scalar_lea.vmem %s836_s24, 128  ;;  %s1361_s16 = smov [#allocation4]  }
 0x11b   : > { %v778_v6 = vadd.f32 %v777_v5, %v747_v4  ;;  %v710_v7 = vadd.f32 %v709_v3, %v1512_v2  ;;  %p1293_p13 = scmp.ne.s32.totalorder %s836_s24, %s1292_s29  ;;  %s1296_s30 = sshll.u32 %s1361_s16, 4  ;;  %s1297_s30 = int_to_ptr.vmem [resolvable:$false] %s1296_s30 }
 0x11c   : > { %s1298_s4 = scalar_lea.vmem %s1297_s30, 256  ;;  %p1299_p2 = scmp.lt.s32.totalorder %s836_s24, %s1297_s30 }
 0x11d   : > { %v711_v10 = vadd.f32 %v1501_v49, %v710_v7  ;;  %v779_v11 = vadd.f32 %v778_v6, %v748_v8  ;;  %v753_v49 = vmul.f32 %v1517_v9, %v1517_v9  ;;  %p1294_p0 = pnand %p1293_p13, %p1420_p5  ;;  %p1300_p3 = scmp.lt.s32.totalorder %s1298_s4, %s1292_s29 }
 0x11f   : > { %v780_v12 = vadd.f32 %v779_v11, %v749_v25  ;;  %v712_v13 = vadd.f32 %v1508_v60, %v711_v10  ;;  %v754_v60 = vmul.f32 %v1524_v20, %v1524_v20  ;;  %p1295_p1 = pneg %p1294_p0  ;;  %p1301_p4 = por %p1300_p3, %p1299_p2 }
 0x121   : > { %v713_v55 = vadd.f32 %v712_v13, %v1521_v15  ;;  %v781_v16 = vadd.f32 %v780_v12, %v750_v36  ;;  %p1302_p7 = pnand %p1301_p4, %p1295_p1 }
 0x123   : > { %v782_v17 = vadd.f32 %v781_v16, %v751_v14  ;;  %v714_v2 = vadd.f32 %v713_v55, %v1528_v27 }
 0x125   : > { %v715_v19 = vadd.f32 %v1517_v9, %v714_v2  ;;  %v783_v21 = vadd.f32 %v782_v17, %v752_v18  ;;  %v756_v9 = vmul.f32 %v1546_v52, %v1546_v52 }
 0x127   : > { %v784_v22 = vadd.f32 %v783_v21, %v753_v49  ;;  %v716_v23 = vadd.f32 %v1524_v20, %v715_v19  ;;  %v758_v20 = vmul.f32 %v1542_v46, %v1542_v46 }
 0x129   : > { %v717_v15 = vadd.f32 %v716_v23, %v1537_v41  ;;  %v785_v26 = vadd.f32 %v784_v22, %v754_v60 }
 0x12b   : > { %v786_v27 = vadd.f32 %v785_v26, %v755_v24  ;;  %v718_v28 = vadd.f32 %v717_v15, %v1546_v52 }
 0x12d   : > { %v719_v30 = vadd.f32 %v1533_v35, %v718_v28  ;;  %v787_v32 = vadd.f32 %v786_v27, %v756_v9 }
 0x12f   : > { %v720_v33 = vadd.f32 %v1542_v46, %v719_v30  ;;  %v788_v34 = vadd.f32 %v787_v32, %v757_v29 }
 0x131   : > { %v721_v37 = vrot.slane %v720_v33, 4  ;;  %v789_v38 = vadd.f32 %v788_v34, %v758_v20 }
 0x133   : > { %v722_v39 = vadd.f32 %v721_v37, %v720_v33  ;;  %v790_v40 = vrot.slane %v789_v38, 4 }
 0x135   : > { %v723_v41 = vrot.slane %v722_v39, 2  ;;  %v791_v43 = vadd.f32 %v790_v40, %v789_v38 }
 0x137   : > { %v724_v44 = vadd.f32 %v723_v41, %v722_v39  ;;  %v792_v45 = vrot.slane %v791_v43, 2 }
 0x139   : > { %v725_v47 = vrot.slane %v724_v44, 1  ;;  %v793_v35 = vadd.f32 %v792_v45, %v791_v43 }
 0x13b   : > { %v794_v48 = vrot.slane %v793_v35, 1  ;;  %v726_v46 = vadd.f32 %v725_v47, %v724_v44 }
 0x13d   : > { %v795_v50 = vadd.f32 %v794_v48, %v793_v35 }
 0x13f   : > { %v797_v51 = vsel %vm796_vm2, %v726_v46, %v795_v50 }
 0x140   : > { %v798_v52 = vsel %vm365_vm0, %v797_v51, 0.0 }
 0x141   : > { %799 = vst [vmem:[%s175_s20] sm:$0xff] %v798_v52 }
 0x142   : > { %1305 = shalt.err (!%p1302_p7)
}
 0x143   : > { %s1306_s5 = scalar_lea.hbm %s1635_s27, 128  ;;  %s1310_s7 = scalar_lea.hbm %s1675_s3, 256 }
 0x144   : > { %p1307_p8 = scmp.ne.s32.totalorder %s1635_s27, %s1306_s5  ;;  %p1311_p11 = scmp.lt.s32.totalorder %s1635_s27, %s1675_s3 }
 0x145   : > { %p1312_p12 = scmp.lt.s32.totalorder %s1310_s7, %s1306_s5 }
 0x146   : > { %p1308_p9 = pnand %p1307_p8, %p1420_p5 }
 0x147   : > { %p1313_p13 = por %p1312_p12, %p1311_p11 }
 0x148   : > { %p1309_p10 = pneg %p1308_p9 }
 0x14a   : > { %p1314_p0 = pnand %p1313_p13, %p1309_p10 }
 0x14c   : > { %1317 = shalt.err (!%p1314_p0)
}
 0x14d   : > { %1202 = dma.vmem_to_hbm [thread:$0]  (%p1420_p5), %s836_s24, 128, %s1635_s27, %s806_s28  }
 0x14e PF: > { %p1212_p1 = scmp.ge.s32.totalorder %s1356_s15, 2  ;;  %s847_s11 = sand.u32 1, %s1344_s12  }
 0x14f   : > { %s848_s17 = scalar_lea.sflag [#allocation3], %s847_s11 }
 0x150   : > { %p1206_p2 = pnand %p1212_p1, %p1424_p6 }
 0x152   : > { %p1207_p3 = pneg %p1206_p2 }
 0x154   : > { %1335 = dma.done.wait (%p1207_p3), %s848_s17, 2048  }
 0x155   : > { %1337 = vsyncadd (%p1207_p3), %s848_s17, 4294965248  ;;  %s857_s19 = scalar_lea.sflag [#allocation5], %s847_s11 }
 0x156   : > { %1339 = dma.done.wait (%p1207_p3), %s857_s19, 128  }
 0x157   : > { %1341 = vsyncadd (%p1207_p3), %s857_s19, 4294967168  ;;  %p17_p5 = scmp.ge.s32.totalorder %s1407_s18, 4   ;;  %s1678_s12 = smov %s1348_s13 }
 0x158   : > { %s1679_s13 = smov %s1352_s14  ;;  %s1680_s14 = smov %s1418_s21 }
 0x159   : > { %s1681_s15 = smov %s1407_s18  ;;  %19 = sbr.rel (!%p17_p5) target bundleno = 5 (0x5), region = 80 }
 0x15e   :  { %862 = vsyncpa [#allocation3], 1 }
 0x15f   :  { %864 = vsyncpa [#allocation3 + $0x1], 1 }
 0x160   :  { %865 = vsyncpa [#allocation5], 1 }
 0x161   :  { %867 = vsyncpa [#allocation5 + $0x1], 1 }

</bundles_post_ra>
